<compile_context>
chip_gen: v7x
topology: tpu7x:2x2x1
jax: 0.10.0
libtpu: 0.0.40
codegen_flags: <defaults>
</compile_context>

<pallas_src>
import functools

import jax
import jax.numpy as jnp
from jax.experimental import pallas as pl
from jax.experimental.pallas import tpu as pltpu


# Logical layer sizes (PyTorch module) and hardware-friendly padded sizes.
D_IN, D_H1, D_H2, D_OUT = 20, 256, 128, 64
K_PAD = 32      # pad first contraction dim 20 -> 32 (sublane aligned)
OUT_PAD = 128   # pad last output dim 64 -> 128 (lane-dense stores)


def nestmlp_kernel(x_ref, w1_ref, b1_ref, w2_ref, b2_ref, w3_ref, b3_ref, o_ref):
    # x_ref: (TILE_B, K_PAD) bf16; weights bf16 (in, out); biases f32 (1, out).
    x = x_ref[...]

    # Linear(20->256) + ReLU.  bf16 MXU matmul, f32 accumulate + f32 epilogue.
    h1 = jnp.dot(x, w1_ref[...], preferred_element_type=jnp.float32) + b1_ref[...]
    h1 = jnp.maximum(h1, 0.0).astype(jnp.bfloat16)

    # Linear(256->128) + ReLU.
    h2 = jnp.dot(h1, w2_ref[...], preferred_element_type=jnp.float32) + b2_ref[...]
    h2 = jnp.maximum(h2, 0.0).astype(jnp.bfloat16)

    # Linear(128->64), stored into a lane-dense (TILE_B, 128) padded bf16 output.
    out = jnp.dot(h2, w3_ref[...], preferred_element_type=jnp.float32) + b3_ref[...]
    o_ref[...] = out.astype(o_ref.dtype)


def _round_up(n, m):
    return -(-n // m) * m


def _choose_tiling(B, tile_b):
    """Balanced batch tiling.

    - Never wastes more than one sublane group (8 rows) of padding per tile.
    - Forces >=2 grid steps when B > 64 so the 'parallel' batch axis can be
      sharded across both TensorCores on v7x (free elsewhere).
    """
    n_tiles = -(-B // tile_b)              # ceil(B / tile_b)
    if n_tiles == 1 and B > 64:
        n_tiles = 2                        # dual-TC split on v7x
    tb = max(8, _round_up(-(-B // n_tiles), 8))
    b_pad = _round_up(B, tb)
    return tb, b_pad


@functools.partial(jax.jit, static_argnames=("tile_b", "return_padded"))
def nestmlp_forward(x, w1, b1, w2, b2, w3, b3, *, tile_b=2048, return_padded=False):
    """x: [B, 20] f32; weights (in, out) f32; biases (1, out) f32.

    Returns [B, 64] f32 by default (PyTorch-equivalent shape/dtype).
    With return_padded=True, returns the raw padded [b_pad, 128] bf16 kernel
    output (valid data in [:B, :64]) to skip the post-kernel slice pass.
    """
    B = x.shape[0]

    # ---- host/wrapper-side layout prep (cheap, traced once under jit) ----
    # Pad K: 20 -> 32 with zeros (contributes nothing to the dot product).
    # (pad + bf16 cast fuse into a single XLA op over the small input.)
    x_p = jnp.pad(x, ((0, 0), (0, K_PAD - D_IN))).astype(jnp.bfloat16)
    w1_p = jnp.pad(w1, ((0, K_PAD - D_IN), (0, 0))).astype(jnp.bfloat16)
    w2_b = w2.astype(jnp.bfloat16)
    # Pad N of the last layer: 64 -> 128 zero columns (sliced off below).
    w3_p = jnp.pad(w3, ((0, 0), (0, OUT_PAD - D_OUT))).astype(jnp.bfloat16)
    b1_f = b1.astype(jnp.float32)
    b2_f = b2.astype(jnp.float32)
    b3_p = jnp.pad(b3, ((0, 0), (0, OUT_PAD - D_OUT))).astype(jnp.float32)

    tb, b_pad = _choose_tiling(B, tile_b)
    if b_pad != B:
        x_p = jnp.pad(x_p, ((0, b_pad - B), (0, 0)))

    grid = (b_pad // tb,)

    const = lambda i: (0, 0)  # weights / biases stay VMEM-resident across steps
    in_specs = [
        pl.BlockSpec((tb, K_PAD), lambda i: (i, 0)),      # x tile
        pl.BlockSpec((K_PAD, D_H1), const),               # w1
        pl.BlockSpec((1, D_H1), const),                   # b1
        pl.BlockSpec((D_H1, D_H2), const),                # w2
        pl.BlockSpec((1, D_H2), const),                   # b2
        pl.BlockSpec((D_H2, OUT_PAD), const),             # w3 (padded N)
        pl.BlockSpec((1, OUT_PAD), const),                # b3 (padded N)
    ]
    out_specs = pl.BlockSpec((tb, OUT_PAD), lambda i: (i, 0))

    flops = 2 * b_pad * (K_PAD * D_H1 + D_H1 * D_H2 + D_H2 * OUT_PAD)
    bytes_accessed = (
        x_p.size * 2                                   # bf16 activations in
        + (w1_p.size + w2_b.size + w3_p.size) * 2      # bf16 weights
        + (b1_f.size + b2_f.size + b3_p.size) * 4      # f32 biases
        + b_pad * OUT_PAD * 2                          # bf16 output
    )

    out_padded = pl.pallas_call(
        nestmlp_kernel,
        out_shape=jax.ShapeDtypeStruct((b_pad, OUT_PAD), jnp.bfloat16),
        grid=grid,
        in_specs=in_specs,
        out_specs=out_specs,
        compiler_params=pltpu.CompilerParams(
            dimension_semantics=("parallel",),
            vmem_limit_bytes=32 * 1024 * 1024,
        ),
        cost_estimate=pl.CostEstimate(
            flops=flops, transcendentals=0, bytes_accessed=bytes_accessed
        ),
    )(x_p, w1_p, b1_f, w2_b, b2_f, w3_p, b3_p)

    if return_padded:
        # Caller slices [:B, :D_OUT] lazily / fuses it into its first consumer.
        return out_padded

    # Drop batch padding + zero columns and upcast to f32 (single fused op).
    return out_padded[:B, :D_OUT].astype(jnp.float32)


def init_params(key):
    """Deterministic init matching PyTorch Linear fan-in bounds.

    Weights are built directly as (in, out) so the kernel computes X @ W + b
    (mathematically identical to torch's X @ W_torch.T + b).
    """
    k1, k2, k3, k4, k5, k6 = jax.random.split(key, 6)

    def uniform(k, shape, fan_in):
        bound = 1.0 / jnp.sqrt(fan_in)
        return jax.random.uniform(k, shape, jnp.float32, -bound, bound)

    w1 = uniform(k1, (D_IN, D_H1), D_IN)
    b1 = uniform(k2, (1, D_H1), D_IN)
    w2 = uniform(k3, (D_H1, D_H2), D_H1)
    b2 = uniform(k4, (1, D_H2), D_H1)
    w3 = uniform(k5, (D_H2, D_OUT), D_H2)
    b3 = uniform(k6, (1, D_OUT), D_H2)
    return w1, b1, w2, b2, w3, b3


def _reference_f32(x, w1, b1, w2, b2, w3, b3):
    r = jnp.maximum(x @ w1 + b1, 0.0)
    r = jnp.maximum(r @ w2 + b2, 0.0)
    return r @ w3 + b3


if __name__ == "__main__":
    key = jax.random.PRNGKey(0)
    kx, kx2, kp = jax.random.split(key, 3)

    w1, b1, w2, b2, w3, b3 = init_params(kp)

    # Small batch: single tile path (grid=(1,)).
    batch = 2
    x = jax.random.normal(kx, (batch, D_IN), dtype=jnp.float32)
    out = nestmlp_forward(x, w1, b1, w2, b2, w3, b3)
    out = jax.block_until_ready(out)
    assert out.shape == (batch, D_OUT) and out.dtype == jnp.float32

    # Reference 1: same bf16-operand / f32-accumulate math in plain JAX.
    xb = x.astype(jnp.bfloat16)
    r = jnp.dot(xb, w1.astype(jnp.bfloat16), preferred_element_type=jnp.float32) + b1
    r = jnp.maximum(r, 0.0).astype(jnp.bfloat16)
    r = jnp.dot(r, w2.astype(jnp.bfloat16), preferred_element_type=jnp.float32) + b2
    r = jnp.maximum(r, 0.0).astype(jnp.bfloat16)
    ref_bf16 = jnp.dot(r, w3.astype(jnp.bfloat16), preferred_element_type=jnp.float32) + b3
    assert jnp.allclose(out, ref_bf16, atol=2e-2, rtol=2e-2)

    # Reference 2: full f32 forward (looser tolerance for the bf16 operands).
    ref = _reference_f32(x, w1, b1, w2, b2, w3, b3)
    assert jnp.allclose(out, ref, atol=5e-2, rtol=5e-2)

    # Medium batch: exercises the balanced / >=2-tile path (dual-TC on v7x)
    # and batch padding removal.
    batch2 = 200
    x2 = jax.random.normal(kx2, (batch2, D_IN), dtype=jnp.float32)
    out2 = jax.block_until_ready(nestmlp_forward(x2, w1, b1, w2, b2, w3, b3))
    assert out2.shape == (batch2, D_OUT)
    ref2 = _reference_f32(x2, w1, b1, w2, b2, w3, b3)
    assert jnp.allclose(out2, ref2, atol=5e-2, rtol=5e-2)

    # Padded-output fast path (skips the post-kernel slice HBM pass).
    outp = jax.block_until_ready(
        nestmlp_forward(x2, w1, b1, w2, b2, w3, b3, return_padded=True)
    )
    assert outp.dtype == jnp.bfloat16 and outp.shape[1] == OUT_PAD
    assert jnp.allclose(
        outp[:batch2, :D_OUT].astype(jnp.float32), ref2, atol=5e-2, rtol=5e-2
    )

    print("KERNEL_OK")
</pallas_src>

<mosaic_0001>
module attributes {stable_mosaic.version = 11 : i64} {
  func.func @nestmlp_kernel(%arg0: i32, %arg1: memref<8x32xbf16, #tpu.memory_space<vmem>>, %arg2: memref<32x256xbf16, #tpu.memory_space<vmem>>, %arg3: memref<1x256xf32, #tpu.memory_space<vmem>>, %arg4: memref<256x128xbf16, #tpu.memory_space<vmem>>, %arg5: memref<1x128xf32, #tpu.memory_space<vmem>>, %arg6: memref<128x128xbf16, #tpu.memory_space<vmem>>, %arg7: memref<1x128xf32, #tpu.memory_space<vmem>>, %arg8: memref<8x128xbf16, #tpu.memory_space<vmem>>) attributes {dimension_semantics = [#tpu.dimension_semantics<parallel>], iteration_bounds = array<i64: 1>, scalar_prefetch = 0 : i64, scratch_operands = 0 : i64, tpu.core_type = #tpu.core_type<tc>, window_params = [{transform_indices = @transform_0, window_bounds = array<i64: 8, 32>}, {pipeline_mode = #tpu.pipeline_mode<synchronous>, transform_indices = @transform_1, window_bounds = array<i64: 32, 256>}, {pipeline_mode = #tpu.pipeline_mode<synchronous>, transform_indices = @transform_2, window_bounds = array<i64: 1, 256>}, {pipeline_mode = #tpu.pipeline_mode<synchronous>, transform_indices = @transform_3, window_bounds = array<i64: 256, 128>}, {pipeline_mode = #tpu.pipeline_mode<synchronous>, transform_indices = @transform_4, window_bounds = array<i64: 1, 128>}, {pipeline_mode = #tpu.pipeline_mode<synchronous>, transform_indices = @transform_5, window_bounds = array<i64: 128, 128>}, {pipeline_mode = #tpu.pipeline_mode<synchronous>, transform_indices = @transform_6, window_bounds = array<i64: 1, 128>}, {transform_indices = @transform_7, window_bounds = array<i64: 8, 128>}]} {
    %c0 = arith.constant 0 : index
    %c0_0 = arith.constant 0 : index
    %0 = vector.load %arg1[%c0, %c0_0] : memref<8x32xbf16, #tpu.memory_space<vmem>>, vector<8x32xbf16>
    %c0_1 = arith.constant 0 : index
    %c0_2 = arith.constant 0 : index
    %1 = vector.load %arg2[%c0_1, %c0_2] : memref<32x256xbf16, #tpu.memory_space<vmem>>, vector<32x256xbf16>
    %cst = arith.constant dense<0.000000e+00> : vector<8x256xf32>
    %2 = tpu.matmul %0, %1, %cst {dimension_numbers = #tpu.dot_dimension_numbers<[1], [0], [0], [1], [0, 0, 1, 1], [], []>} : vector<8x32xbf16>, vector<32x256xbf16>, vector<8x256xf32> -> vector<8x256xf32>
    %c0_3 = arith.constant 0 : index
    %c0_4 = arith.constant 0 : index
    %3 = vector.load %arg3[%c0_3, %c0_4] : memref<1x256xf32, #tpu.memory_space<vmem>>, vector<1x256xf32>
    %4 = vector.broadcast %3 : vector<1x256xf32> to vector<8x256xf32>
    %5 = arith.addf %2, %4 : vector<8x256xf32>
    %cst_5 = arith.constant 0.000000e+00 : f32
    %6 = vector.broadcast %cst_5 : f32 to vector<8x256xf32>
    %7 = arith.maximumf %5, %6 : vector<8x256xf32>
    %8 = arith.truncf %7 : vector<8x256xf32> to vector<8x256xbf16>
    %c0_6 = arith.constant 0 : index
    %c0_7 = arith.constant 0 : index
    %9 = vector.load %arg4[%c0_6, %c0_7] : memref<256x128xbf16, #tpu.memory_space<vmem>>, vector<256x128xbf16>
    %cst_8 = arith.constant dense<0.000000e+00> : vector<8x128xf32>
    %10 = tpu.matmul %8, %9, %cst_8 {dimension_numbers = #tpu.dot_dimension_numbers<[1], [0], [0], [1], [0, 0, 1, 1], [], []>} : vector<8x256xbf16>, vector<256x128xbf16>, vector<8x128xf32> -> vector<8x128xf32>
    %c0_9 = arith.constant 0 : index
    %c0_10 = arith.constant 0 : index
    %11 = vector.load %arg5[%c0_9, %c0_10] : memref<1x128xf32, #tpu.memory_space<vmem>>, vector<1x128xf32>
    %12 = vector.broadcast %11 : vector<1x128xf32> to vector<8x128xf32>
    %13 = arith.addf %10, %12 : vector<8x128xf32>
    %cst_11 = arith.constant 0.000000e+00 : f32
    %14 = vector.broadcast %cst_11 : f32 to vector<8x128xf32>
    %15 = arith.maximumf %13, %14 : vector<8x128xf32>
    %16 = arith.truncf %15 : vector<8x128xf32> to vector<8x128xbf16>
    %c0_12 = arith.constant 0 : index
    %c0_13 = arith.constant 0 : index
    %17 = vector.load %arg6[%c0_12, %c0_13] : memref<128x128xbf16, #tpu.memory_space<vmem>>, vector<128x128xbf16>
    %cst_14 = arith.constant dense<0.000000e+00> : vector<8x128xf32>
    %18 = tpu.matmul %16, %17, %cst_14 {dimension_numbers = #tpu.dot_dimension_numbers<[1], [0], [0], [1], [0, 0, 1, 1], [], []>} : vector<8x128xbf16>, vector<128x128xbf16>, vector<8x128xf32> -> vector<8x128xf32>
    %c0_15 = arith.constant 0 : index
    %c0_16 = arith.constant 0 : index
    %19 = vector.load %arg7[%c0_15, %c0_16] : memref<1x128xf32, #tpu.memory_space<vmem>>, vector<1x128xf32>
    %20 = vector.broadcast %19 : vector<1x128xf32> to vector<8x128xf32>
    %21 = arith.addf %18, %20 : vector<8x128xf32>
    %22 = arith.truncf %21 : vector<8x128xf32> to vector<8x128xbf16>
    %c0_17 = arith.constant 0 : index
    %c0_18 = arith.constant 0 : index
    %23 = vector.load %arg8[%c0_17, %c0_18] : memref<8x128xbf16, #tpu.memory_space<vmem>>, vector<8x128xbf16>
    tpu.vector_store %arg8[%c0_17, %c0_18], %22 {strides = array<i32>} : memref<8x128xbf16, #tpu.memory_space<vmem>>, vector<8x128xbf16>,
    return
  }
  func.func @transform_0(%arg0: i32) -> (i32, i32) {
    %c0_i32 = arith.constant 0 : i32
    %c0_i32_0 = arith.constant 0 : i32
    return %arg0, %c0_i32 : i32, i32
  }
  func.func @transform_1(%arg0: i32) -> (i32, i32) {
    %c0_i32 = arith.constant 0 : i32
    %c0_i32_0 = arith.constant 0 : i32
    %c0_i32_1 = arith.constant 0 : i32
    return %c0_i32, %c0_i32_0 : i32, i32
  }
  func.func @transform_2(%arg0: i32) -> (i32, i32) {
    %c0_i32 = arith.constant 0 : i32
    %c0_i32_0 = arith.constant 0 : i32
    %c0_i32_1 = arith.constant 0 : i32
    return %c0_i32, %c0_i32_0 : i32, i32
  }
  func.func @transform_3(%arg0: i32) -> (i32, i32) {
    %c0_i32 = arith.constant 0 : i32
    %c0_i32_0 = arith.constant 0 : i32
    %c0_i32_1 = arith.constant 0 : i32
    return %c0_i32, %c0_i32_0 : i32, i32
  }
  func.func @transform_4(%arg0: i32) -> (i32, i32) {
    %c0_i32 = arith.constant 0 : i32
    %c0_i32_0 = arith.constant 0 : i32
    %c0_i32_1 = arith.constant 0 : i32
    return %c0_i32, %c0_i32_0 : i32, i32
  }
  func.func @transform_5(%arg0: i32) -> (i32, i32) {
    %c0_i32 = arith.constant 0 : i32
    %c0_i32_0 = arith.constant 0 : i32
    %c0_i32_1 = arith.constant 0 : i32
    return %c0_i32, %c0_i32_0 : i32, i32
  }
  func.func @transform_6(%arg0: i32) -> (i32, i32) {
    %c0_i32 = arith.constant 0 : i32
    %c0_i32_0 = arith.constant 0 : i32
    %c0_i32_1 = arith.constant 0 : i32
    return %c0_i32, %c0_i32_0 : i32, i32
  }
  func.func @transform_7(%arg0: i32) -> (i32, i32) {
    %c0_i32 = arith.constant 0 : i32
    %c0_i32_0 = arith.constant 0 : i32
    return %arg0, %c0_i32 : i32, i32
  }
}

</mosaic_0001>

<bundles_post_ra>
// kernel: nestmlp_forward.1
= control target key start
LH: loop header
LB: loop body
LE: loop exit
PB: predicated region body
PF: predicated region fallthrough
CT: control target
= control target key end

     0   :  { %v522_v1 = vmov 0   ;;  %vm64_vm0 = vcmask 261120   ;;  %v523_v22 = vmov 0.0   ;;  %v34_v29 = vlaneseq  ;;  %s664_s1 = inlined_call_operand.vmem [shape: bf16[32,256], index: 1, kind: input, shape index: {}]   ;;  %s665_s3 = inlined_call_operand.vmem [shape: bf16[256,128], index: 3, kind: input, shape index: {}]   ;;  %s666_s0 = inlined_call_operand.vmem [shape: bf16[8,32], index: 0, kind: input, shape index: {}]   ;;  %s667_s5 = inlined_call_operand.vmem [shape: bf16[128,128], index: 5, kind: input, shape index: {}]   ;;  %s668_s2 = inlined_call_operand.vmem [shape: f32[1,256], index: 2, kind: input, shape index: {}]   ;;  %s669_s4 = inlined_call_operand.vmem [shape: f32[1,128], index: 4, kind: input, shape index: {}]   ;;  %s670_s6 = inlined_call_operand.vmem [shape: f32[1,128], index: 6, kind: input, shape index: {}]   ;;  %s671_s7 = inlined_call_operand.vmem [shape: bf16[8,128], index: 7, kind: output, shape index: {}]  }
   0x1   :  { %v492_v0 = vld [vmem:[%s664_s1 + $0x4] ss:$8 sps:$4 sm:$0xff]   ;;  %100 = vmatprep.mubr.bf16.mxu0 %v522_v1  ;;  %v494_v2 = vld [vmem:[%s664_s1] ss:$8 sps:$4 sm:$0xff]   ;;  %v495_v3 = vld [vmem:[%s664_s1 + $0x14] ss:$8 sps:$4 sm:$0xff]  }
   0x2   :  { %68 = vmatprep.subr.bf16.mxu0 %v492_v0  ;;  %v497_v4 = vld [vmem:[%s664_s1 + $0x10] ss:$8 sps:$4 sm:$0xff]   ;;  %v498_v5 = vld [vmem:[%s665_s3 + $0x40] sm:$0xff]   ;;  %v500_v8 = vld [vmem:[%s665_s3 + $0x48] sm:$0xff]   ;;  %v35_v30 = vshrl.u32 %v34_v29, 7  ;;  %vm524_vm1 = vmmov 0  }
   0x3   :  { %69 = vmatpush1.bf16.msra.mxu0 %v494_v2  ;;  %v499_v6 = vld [vmem:[%s665_s3] sm:$0xff]   ;;  %438 = vmatprep.subr.bf16.mxu1 %v498_v5  ;;  %v501_v9 = vld [vmem:[%s665_s3 + $0x8] sm:$0xff]   ;;  %v502_v10 = vld [vmem:[%s665_s3 + $0x50] sm:$0xff]  }
   0x4   :  { %70 = vmatprep.subr.bf16.mxu0 %v495_v3  ;;  %v27_v7 = vld [vmem:[%s666_s0] sm:$0xf]  ;;  %439 = vmatpush3.bf16.msra.mxu1 %v499_v6  ;;  %v503_v11 = vld [vmem:[%s665_s3 + $0x10] sm:$0xff]   ;;  %v504_v12 = vld [vmem:[%s665_s3 + $0x58] sm:$0xff]   ;;  %v36_v31 = vsub.s32 0, %v35_v30  ;;  %v40_v33 = vsub.s32 1, %v35_v30 }
   0x5   :  { %440 = vmatprep.subr.bf16.mxu1 %v500_v8  ;;  %v505_v13 = vld [vmem:[%s665_s3 + $0x18] sm:$0xff]   ;;  %v506_v14 = vld [vmem:[%s665_s3 + $0x60] sm:$0xff]   ;;  %v508_v16 = vld [vmem:[%s665_s3 + $0x68] sm:$0xff]  }
   0x6   :  { %v507_v15 = vld [vmem:[%s665_s3 + $0x20] sm:$0xff]   ;;  %v509_v17 = vld [vmem:[%s665_s3 + $0x28] sm:$0xff]   ;;  %v510_v18 = vld [vmem:[%s665_s3 + $0x70] sm:$0xff]  }
   0x7   :  { %71 = vmatpush1.bf16.msra.mxu0 %v497_v4  ;;  %v511_v19 = vld [vmem:[%s665_s3 + $0x30] sm:$0xff]   ;;  %v512_v20 = vld [vmem:[%s665_s3 + $0x78] sm:$0xff]   ;;  %v514_v23 = vld [vmem:[%s667_s5] sm:$0xff]  }
   0x8   :  { %441 = vmatpush3.bf16.msra.mxu1 %v501_v9  ;;  %v513_v21 = vld [vmem:[%s665_s3 + $0x38] sm:$0xff]   ;;  %469 = vmatprep.subr.bf16.mxu0 %v523_v22  ;;  %v515_v24 = vld [vmem:[%s667_s5 + $0x8] sm:$0xff]   ;;  %v516_v25 = vld [vmem:[%s667_s5 + $0x10] sm:$0xff]  }
   0x9   :  { %442 = vmatprep.subr.bf16.mxu1 %v502_v10  ;;  %v517_v26 = vld [vmem:[%s667_s5 + $0x18] sm:$0xff]   ;;  %v518_v27 = vld [vmem:[%s667_s5 + $0x20] sm:$0xff]   ;;  %v519_v28 = vld [vmem:[%s667_s5 + $0x28] sm:$0xff]  }
   0xa   :  { %411 = vmatmul.mubr.msk.bf16.vlgmr.msra.gmra.mrb[0].mxu0 %vm64_vm0, %v27_v7  ;;  %v32_v32 = vld [vmem:[%s668_s2] sm:$0x3]  ;;  %v520_v46 = vld [vmem:[%s667_s5 + $0x30] sm:$0xff]   ;;  %v521_v47 = vld [vmem:[%s667_s5 + $0x38] sm:$0xff]  }
   0xb   :  { %470 = vmatpush3.bf16.msra.mxu0 %v514_v23  ;;  %v37_v34 = vrot.slane %v32_v32, %v36_v31  ;;  %v41_v35 = vrot.slane %v32_v32, %v40_v33  ;;  %485 = vmatprep.mubr.msk.bf16.mxu0 %vm524_vm1, %v523_v22  ;;  %v412_v49 = vld [vmem:[%s669_s4] ss:$0 sm:$0xff] }
   0xc   :  { %443 = vmatpush3.bf16.msra.mxu1 %v503_v11  ;;  %471 = vmatprep.subr.bf16.mxu0 %v523_v22  ;;  %v429_v57 = vld [vmem:[%s670_s6] ss:$0 sm:$0xff] }
   0xd   :  { %444 = vmatprep.subr.bf16.mxu1 %v504_v12 }
   0xf   :  { %472 = vmatpush3.bf16.msra.mxu0 %v515_v24 }
  0x10   :  { %445 = vmatpush3.bf16.msra.mxu1 %v505_v13  ;;  %473 = vmatprep.subr.bf16.mxu0 %v523_v22 }
  0x11   :  { %446 = vmatprep.subr.bf16.mxu1 %v506_v14 }
  0x13   :  { %474 = vmatpush3.bf16.msra.mxu0 %v516_v25 }
  0x14   :  { %447 = vmatpush3.bf16.msra.mxu1 %v507_v15  ;;  %475 = vmatprep.subr.bf16.mxu0 %v523_v22 }
  0x15   :  { %448 = vmatprep.subr.bf16.mxu1 %v508_v16 }
  0x17   :  { %476 = vmatpush3.bf16.msra.mxu0 %v517_v26 }
  0x18   :  { %449 = vmatpush3.bf16.msra.mxu1 %v509_v17  ;;  %477 = vmatprep.subr.bf16.mxu0 %v523_v22 }
  0x19   :  { %450 = vmatprep.subr.bf16.mxu1 %v510_v18 }
  0x1b   :  { %478 = vmatpush3.bf16.msra.mxu0 %v518_v27 }
  0x1c   :  { %451 = vmatpush3.bf16.msra.mxu1 %v511_v19  ;;  %479 = vmatprep.subr.bf16.mxu0 %v523_v22 }
  0x1d   :  { %452 = vmatprep.subr.bf16.mxu1 %v512_v20 }
  0x1f   :  { %480 = vmatpush3.bf16.msra.mxu0 %v519_v28 }
  0x20   :  { %453 = vmatpush3.bf16.msra.mxu1 %v513_v21  ;;  %481 = vmatprep.subr.bf16.mxu0 %v523_v22 }
  0x23   :  { %482 = vmatpush3.bf16.msra.mxu0 %v520_v46 }
  0x24   :  { %483 = vmatprep.subr.bf16.mxu0 %v523_v22 }
  0x27   :  { %484 = vmatpush3.bf16.msra.mxu0 %v521_v47 }
  0xdd   :  { %v102_v36 = vpop.f32.mrb[0].mxu0 }
  0xde   :  { %v103_v37 = vadd.f32 %v102_v36, %v37_v34  ;;  %v104_v38 = vpop.f32.mrb[1].mxu0 }
  0xdf   :  { %v105_v39 = vadd.f32 %v104_v38, %v41_v35  ;;  %v106_v40 = vpop.f32.mrb[2].mxu0 }
  0xe0   :  { %v109_v41 = vmax.f32 %v103_v37, 0.0  ;;  %v107_v42 = vpop.f32.mrb[3].mxu0 }
  0xe1   :  { %v110_v43 = vmax.f32 %v105_v39, 0.0 }
  0xe2   :  { %v111_v45 = vpack.c.bf16 %v109_v41, %v109_v41 }
  0xe3   :  { %v112_v44 = vpack.c.bf16 %v110_v43, %v110_v43 }
  0xe5   :  { %280 = vmatprep.mubr.bf16.mxu1 %v112_v44 }
  0xe6   :  { %281 = vmatmul.mubr.bf16.vlgmr.msra.gmra.mrb[0].mxu1 %v111_v45 }
 0x1b9   :  { %v454_v48 = vpop.f32.mrb[0].mxu1 }
 0x1ba   :  { %v455_v50 = vpop.f32.mrb[1].mxu1 }
 0x1bb   :  { %v456_v51 = vadd.f32 %v455_v50, %v454_v48  ;;  %v457_v52 = vpop.f32.mrb[2].mxu1 }
 0x1bc   :  { %v458_v53 = vpop.f32.mrb[3].mxu1 }
 0x1bd   :  { %v283_v54 = vadd.f32 %v456_v51, %v412_v49 }
 0x1bf   :  { %v288_v55 = vmax.f32 %v283_v54, 0.0 }
 0x1c1   :  { %v289_v56 = vpack.c.bf16 %v288_v55, %v288_v55 }
 0x1c3   :  { %486 = vmatmul.mubr.bf16.vlgmr.msra.gmra.mrb[4].mxu0 %v289_v56 }
 0x296   :  { %v395_v58 = vpop.f32.mrb[4].mxu0 }
 0x297   :  { %v396_v59 = vadd.f32 %v429_v57, %v395_v58  ;;  %v487_v60 = vpop.f32.mrb[5].mxu0 }
 0x298   :  { %v398_v61 = vpop.f32.mrb[6].mxu0 }
 0x299   :  { %v401_v62 = vpack.c.bf16 %v396_v59, %v396_v59  ;;  %v488_v63 = vpop.f32.mrb[7].mxu0 }
 0x29b   :  { %402 = vst [vmem:[%s671_s7] sm:$0xf] %v401_v62 }

</bundles_post_ra>
